<compile_context>
chip_gen: v6e
topology: v6e:2x2x1
jax: 0.10.0
libtpu: 0.0.40
codegen_flags: <defaults>
</compile_context>

<pallas_src>
import functools

import jax
import jax.numpy as jnp
from jax.experimental import pallas as pl
from jax.experimental.pallas import tpu as pltpu

_LANE = 128
_SUBLANE = 8
_DENSE_ROW_TARGET = 2048  # dense (128-lane) rows per grid step for small dim


def _cdiv(a: int, b: int) -> int:
    return -(-a // b)


def _round_up(a: int, b: int) -> int:
    return _cdiv(a, b) * b


# --------------------------------------------------------------------------- #
# Chip / VMEM introspection
# --------------------------------------------------------------------------- #
@functools.lru_cache(maxsize=1)
def _chip_info():
    """Returns (per-TC VMEM capacity bytes, has_two_tensorcores)."""
    vmem_cap = 128 << 20
    two_tc = False
    try:
        kind = jax.devices()[0].device_kind.lower()
    except Exception:  # pragma: no cover - CPU/interpret fallback
        kind = ""
    if "v7" in kind:
        vmem_cap = 64 << 20
        two_tc = True
    info_cap = None
    try:
        info_cap = int(pltpu.get_tpu_info().vmem_capacity_bytes)
    except Exception:
        info_cap = None
    if info_cap is not None and (16 << 20) <= info_cap <= (256 << 20):
        # On 2-TC parts never trust a number larger than the per-TC heuristic.
        vmem_cap = min(vmem_cap, info_cap) if two_tc else info_cap
    return vmem_cap, two_tc


def _vmem_limit_bytes(double_buffered_bytes: int, single_bytes: int = 0) -> int:
    """Scoped-VMEM limit sized from the actual footprint, capped with ~25%
    headroom below the physical per-TC VMEM (48 MiB v7x / 96 MiB v5e-v6e)."""
    vmem_cap, _ = _chip_info()
    cap = vmem_cap * 3 // 4
    need = 2 * double_buffered_bytes + single_bytes + (4 << 20)
    lo = min(32 << 20, cap)
    return int(min(max(need, lo), cap))


def _pick_row_tile(rows: int, target: int) -> int:
    """Largest multiple-of-8 row tile <= min(target, rows). Grids use cdiv, so
    no divisibility requirement.  On 2-TC chips (v7x) prefer an even >=2-step
    grid so both TensorCores get balanced halves; single-TC chips keep the
    biggest tile (fewest grid steps)."""
    _, two_tc = _chip_info()
    tile = min(int(target), rows)
    tile -= tile % _SUBLANE
    if tile <= 0:
        return rows  # rows < 8: single full-extent block (legal block shape)
    if two_tc:
        steps = _cdiv(rows, tile)
        if steps == 1 and rows > _SUBLANE:
            tile = min(tile, max(_SUBLANE, _round_up(_cdiv(rows, 2), _SUBLANE)))
        elif steps > 1 and steps % 2 == 1:
            cand = _round_up(_cdiv(rows, steps + 1), _SUBLANE)
            if 0 < cand <= tile:
                tile = cand
    return tile


# --------------------------------------------------------------------------- #
# Kernels
# --------------------------------------------------------------------------- #
def _whole_w_kernel(x_ref, w_ref, o_ref):
    # One MXU matmul per grid step, f32 accumulation on the MXU.
    o_ref[...] = jnp.dot(
        x_ref[...], w_ref[...], preferred_element_type=jnp.float32
    ).astype(o_ref.dtype)


def _tiled_matmul_f32_kernel(x_ref, w_ref, o_ref):
    # f32 output: accumulate directly into the resident output block
    # (no acc scratch, no final copy).
    @pl.when(pl.program_id(2) == 0)
    def _():
        o_ref[...] = jnp.zeros_like(o_ref)

    o_ref[...] += jnp.dot(x_ref[...], w_ref[...], preferred_element_type=jnp.float32)


def _tiled_matmul_kernel(x_ref, w_ref, o_ref, acc_ref):
    # Non-f32 output: accumulate in f32 scratch, cast once at the end.
    @pl.when(pl.program_id(2) == 0)
    def _():
        acc_ref[...] = jnp.zeros_like(acc_ref)

    acc_ref[...] += jnp.dot(x_ref[...], w_ref[...], preferred_element_type=jnp.float32)

    @pl.when(pl.program_id(2) == pl.num_programs(2) - 1)
    def _():
        o_ref[...] = acc_ref[...].astype(o_ref.dtype)


# --------------------------------------------------------------------------- #
# Forward-pass paths
# --------------------------------------------------------------------------- #
def _forward_lane_dense(x, w, n, d, row_tile, out_dtype):
    """dim < 128 and dim | 128: lane-dense view + block-diagonal W."""
    reps = _LANE // d
    # y_dense = x_dense @ kron(I_reps, W): each dense row packs `reps` samples,
    # and the block-diagonal RHS applies W independently to each packed sample.
    w_big = jnp.kron(jnp.eye(reps, dtype=w.dtype), w)  # (128, 128)
    rows = (n * d) // _LANE
    x_dense = x.reshape(rows, _LANE)  # free row-major reinterpretation in HBM

    dense_target = max((row_tile * d) // _LANE, _DENSE_ROW_TARGET)
    tile = _pick_row_tile(rows, dense_target)
    grid_steps = _cdiv(rows, tile)

    in_isz = jnp.dtype(x.dtype).itemsize
    out_isz = jnp.dtype(out_dtype).itemsize
    dbl_bytes = tile * _LANE * (in_isz + out_isz) + _LANE * _LANE * in_isz
    cost = pl.CostEstimate(
        flops=2 * rows * _LANE * _LANE,  # actual executed flops (block-diag W)
        transcendentals=0,
        bytes_accessed=rows * _LANE * (in_isz + out_isz)
        + grid_steps * _LANE * _LANE * in_isz,
    )

    y_dense = pl.pallas_call(
        _whole_w_kernel,
        out_shape=jax.ShapeDtypeStruct((rows, _LANE), out_dtype),
        grid=(grid_steps,),
        in_specs=[
            pl.BlockSpec((tile, _LANE), lambda i: (i, 0)),  # lane-dense x tile
            pl.BlockSpec((_LANE, _LANE), lambda i: (0, 0)),  # grid-invariant W
        ],
        out_specs=pl.BlockSpec((tile, _LANE), lambda i: (i, 0)),
        compiler_params=pltpu.CompilerParams(
            dimension_semantics=("parallel",),
            vmem_limit_bytes=_vmem_limit_bytes(dbl_bytes),
        ),
        cost_estimate=cost,
    )(x_dense, w_big)
    return y_dense.reshape(n, d)


def _forward_whole_w(x, w, n, d, row_tile, out_dtype):
    """Row-tiled x, whole (d, d) W resident in VMEM. Row tile is sized from
    the generation-specific VMEM budget."""
    vmem_cap, _ = _chip_info()
    in_isz = jnp.dtype(x.dtype).itemsize
    out_isz = jnp.dtype(out_dtype).itemsize

    budget = (vmem_cap * 3 // 4) - 2 * d * d * in_isz - (8 << 20)
    tile_cap = max(_SUBLANE, budget // max(1, 2 * d * (in_isz + out_isz)))
    tile = _pick_row_tile(n, min(row_tile, tile_cap))
    grid_steps = _cdiv(n, tile)

    dbl_bytes = tile * d * (in_isz + out_isz) + d * d * in_isz
    cost = pl.CostEstimate(
        flops=2 * n * d * d,
        transcendentals=0,
        bytes_accessed=n * d * (in_isz + out_isz) + grid_steps * d * d * in_isz,
    )

    return pl.pallas_call(
        _whole_w_kernel,
        out_shape=jax.ShapeDtypeStruct((n, d), out_dtype),
        grid=(grid_steps,),
        in_specs=[
            pl.BlockSpec((tile, d), lambda i: (i, 0)),
            pl.BlockSpec((d, d), lambda i: (0, 0)),
        ],
        out_specs=pl.BlockSpec((tile, d), lambda i: (i, 0)),
        compiler_params=pltpu.CompilerParams(
            dimension_semantics=("parallel",),
            vmem_limit_bytes=_vmem_limit_bytes(dbl_bytes),
        ),
        cost_estimate=cost,
    )(x, w)


def _forward_tiled(x, w, n, d, row_tile, out_dtype):
    """Large dim (multiple of 128): 3-D tiled matmul. Large tiles
    (tn=tk=512, tm up to 1024; tm<=512 on v7x) cut redundant x/W re-streaming;
    f32 outputs accumulate in-place (no scratch)."""
    vmem_cap, _ = _chip_info()
    in_isz = jnp.dtype(x.dtype).itemsize
    out_isz = jnp.dtype(out_dtype).itemsize

    tn = tk = 512
    while d % tn:
        tn //= 2
    while d % tk:
        tk //= 2
    tm_target = 512 if vmem_cap <= (80 << 20) else 1024
    tm = _pick_row_tile(n, min(row_tile, tm_target))
    grid = (_cdiv(n, tm), d // tn, d // tk)

    f32_out = jnp.dtype(out_dtype) == jnp.dtype(jnp.float32)
    kernel = _tiled_matmul_f32_kernel if f32_out else _tiled_matmul_kernel
    scratch = [] if f32_out else [pltpu.VMEM((tm, tn), jnp.float32)]
    single_bytes = 0 if f32_out else tm * tn * 4

    dbl_bytes = (tm * tk + tk * tn) * in_isz + tm * tn * out_isz
    cost = pl.CostEstimate(
        flops=2 * n * d * d,
        transcendentals=0,
        bytes_accessed=n * d * in_isz * (d // tn)       # x re-streamed per N pass
        + d * d * in_isz * grid[0]                      # W re-streamed per M pass
        + n * d * out_isz,
    )

    return pl.pallas_call(
        kernel,
        out_shape=jax.ShapeDtypeStruct((n, d), out_dtype),
        grid=grid,
        in_specs=[
            pl.BlockSpec((tm, tk), lambda i, j, k: (i, k)),
            pl.BlockSpec((tk, tn), lambda i, j, k: (k, j)),
        ],
        out_specs=pl.BlockSpec((tm, tn), lambda i, j, k: (i, j)),
        scratch_shapes=scratch,
        compiler_params=pltpu.CompilerParams(
            dimension_semantics=("parallel", "parallel", "arbitrary"),
            vmem_limit_bytes=_vmem_limit_bytes(dbl_bytes, single_bytes),
        ),
        cost_estimate=cost,
    )(x, w)


# --------------------------------------------------------------------------- #
# Public wrapper (ICAModel.forward)
# --------------------------------------------------------------------------- #
def ica_forward(x: jax.Array, w: jax.Array, *, row_tile: int = 2048,
                io_dtype=None) -> jax.Array:
    """Compute forward(x) = x @ W with a Pallas TPU kernel.

    x: (num_samples, dim); w: (dim, dim).
    row_tile: target number of logical sample rows per grid step.
    io_dtype: optional reduced-precision dtype (e.g. jnp.bfloat16) for HBM
              traffic on these memory-bound shapes; MXU accumulation stays f32.
    """
    n, d = x.shape
    assert w.shape == (d, d)

    out_dtype = x.dtype if io_dtype is None else jnp.dtype(io_dtype)
    if io_dtype is not None:
        x = x.astype(io_dtype)
        w = w.astype(io_dtype)

    vmem_cap, _ = _chip_info()

    # Path 1: lane-dense repack for small dim that divides 128.
    if d < _LANE and _LANE % d == 0 and (n * d) % _LANE == 0:
        return _forward_lane_dense(x, w, n, d, row_tile, out_dtype)

    # Pad columns to a multiple of 128 when the overhead is bounded (<=2x):
    # turns masked vst.msk partial stores into full-lane stores.
    d_pad = d
    if d % _LANE != 0:
        cand = _round_up(d, _LANE)
        if cand <= 2 * d:
            d_pad = cand
    if d_pad != d:
        x = jnp.pad(x, ((0, 0), (0, d_pad - d)))
        w = jnp.pad(w, ((0, d_pad - d), (0, d_pad - d)))

    # Path 2/3: whole-W resident (mid dim) vs 3-D tiled (large dim).
    # 128-MiB parts (v5e/v6e) keep W resident up to dim=1024; v7x (64 MiB)
    # switches to the tiled path at dim>=512.
    tiled_cutoff = 512 if vmem_cap <= (80 << 20) else 1152
    if d_pad % _LANE == 0 and d_pad >= tiled_cutoff:
        y = _forward_tiled(x, w, n, d_pad, row_tile, out_dtype)
    else:
        y = _forward_whole_w(x, w, n, d_pad, row_tile, out_dtype)
    return y[:, :d] if d_pad != d else y


# TODO(synk): ICAModel.loss() uses torch.slogdet(W) + a Laplace log-prob; the
# slogdet has no clean single-kernel Pallas equivalent and is left to plain JAX
# (jnp.linalg.slogdet).


if __name__ == "__main__":
    key = jax.random.PRNGKey(0)
    k1, k2, k3, k4 = jax.random.split(key, 4)

    # Module-faithful example: W initialized to eye(dim), x ~ N(0, 1).
    num_samples, dim = 128, 32
    W = jnp.eye(dim, dtype=jnp.float32)
    x = jax.random.normal(k1, (num_samples, dim), dtype=jnp.float32)

    y = jax.block_until_ready(ica_forward(x, W))
    assert y.shape == (num_samples, dim)
    assert jnp.allclose(y, x @ W, atol=1e-5, rtol=1e-5)

    # Non-identity W exercises the lane-dense block-diagonal packing.
    W2 = W + 0.1 * jax.random.normal(k2, (dim, dim), dtype=jnp.float32)
    y2 = jax.block_until_ready(ica_forward(x, W2))
    assert jnp.allclose(y2, x @ W2, atol=1e-4, rtol=1e-4)

    # Ragged sample count (cdiv grid, partial last block).
    x3 = jax.random.normal(k3, (100, dim), dtype=jnp.float32)
    y3 = jax.block_until_ready(ica_forward(x3, W2))
    assert jnp.allclose(y3, x3 @ W2, atol=1e-4, rtol=1e-4)

    # dim not a divisor of 128 -> column-padded whole-W path.
    dim4 = 96
    W4 = jnp.eye(dim4, dtype=jnp.float32) + 0.05 * jax.random.normal(
        k4, (dim4, dim4), dtype=jnp.float32)
    x4 = jax.random.normal(k1, (64, dim4), dtype=jnp.float32)
    y4 = jax.block_until_ready(ica_forward(x4, W4))
    assert jnp.allclose(y4, x4 @ W4, atol=1e-4, rtol=1e-4)

    # Compile/run-check the 3-D tiled path (used for large dim at dispatch).
    dim5 = 512
    W5 = jnp.eye(dim5, dtype=jnp.float32)
    x5 = jax.random.normal(k2, (256, dim5), dtype=jnp.float32)
    y5 = jax.block_until_ready(_forward_tiled(x5, W5, 256, dim5, 2048, jnp.float32))
    assert jnp.allclose(y5, x5 @ W5, atol=1e-4, rtol=1e-4)

    print("KERNEL_OK")
</pallas_src>

<mosaic_0001>
module attributes {stable_mosaic.version = 11 : i64} {
  func.func @_whole_w_kernel(%arg0: i32, %arg1: memref<32x128xf32, #tpu.memory_space<vmem>>, %arg2: memref<128x128xf32, #tpu.memory_space<vmem>>, %arg3: memref<32x128xf32, #tpu.memory_space<vmem>>) attributes {dimension_semantics = [#tpu.dimension_semantics<parallel>], iteration_bounds = array<i64: 1>, scalar_prefetch = 0 : i64, scratch_operands = 0 : i64, tpu.core_type = #tpu.core_type<tc>, window_params = [{transform_indices = @transform_0, window_bounds = array<i64: 32, 128>}, {pipeline_mode = #tpu.pipeline_mode<synchronous>, transform_indices = @transform_1, window_bounds = array<i64: 128, 128>}, {transform_indices = @transform_2, window_bounds = array<i64: 32, 128>}]} {
    %c0 = arith.constant 0 : index
    %c0_0 = arith.constant 0 : index
    %0 = vector.load %arg1[%c0, %c0_0] : memref<32x128xf32, #tpu.memory_space<vmem>>, vector<32x128xf32>
    %c0_1 = arith.constant 0 : index
    %c0_2 = arith.constant 0 : index
    %1 = vector.load %arg2[%c0_1, %c0_2] : memref<128x128xf32, #tpu.memory_space<vmem>>, vector<128x128xf32>
    %cst = arith.constant dense<0.000000e+00> : vector<32x128xf32>
    %2 = tpu.matmul %0, %1, %cst {dimension_numbers = #tpu.dot_dimension_numbers<[1], [0], [0], [1], [0, 0, 1, 1], [], []>} : vector<32x128xf32>, vector<128x128xf32>, vector<32x128xf32> -> vector<32x128xf32>
    %c0_3 = arith.constant 0 : index
    %c0_4 = arith.constant 0 : index
    %3 = vector.load %arg3[%c0_3, %c0_4] : memref<32x128xf32, #tpu.memory_space<vmem>>, vector<32x128xf32>
    tpu.vector_store %arg3[%c0_3, %c0_4], %2 {strides = array<i32>} : memref<32x128xf32, #tpu.memory_space<vmem>>, vector<32x128xf32>,
    return
  }
  func.func @transform_0(%arg0: i32) -> (i32, i32) {
    %c0_i32 = arith.constant 0 : i32
    %c0_i32_0 = arith.constant 0 : i32
    return %arg0, %c0_i32 : i32, i32
  }
  func.func @transform_1(%arg0: i32) -> (i32, i32) {
    %c0_i32 = arith.constant 0 : i32
    %c0_i32_0 = arith.constant 0 : i32
    %c0_i32_1 = arith.constant 0 : i32
    return %c0_i32, %c0_i32_0 : i32, i32
  }
  func.func @transform_2(%arg0: i32) -> (i32, i32) {
    %c0_i32 = arith.constant 0 : i32
    %c0_i32_0 = arith.constant 0 : i32
    return %arg0, %c0_i32 : i32, i32
  }
}

</mosaic_0001>

<bundles_post_ra>
// kernel: tpu_custom_call.1
= control target key start
LH: loop header
LB: loop body
LE: loop exit
PB: predicated region body
PF: predicated region fallthrough
CT: control target
= control target key end

     0   :  { %7 = vsyncpa [#allocation3], 0  ;;  %s366_s0 = inlined_call_operand.hbm [shape: f32[32,128], index: 0, kind: input, shape index: {}]   ;;  %s367_s1 = inlined_call_operand.hbm [shape: f32[128,128], index: 1, kind: input, shape index: {}]   ;;  %s368_s2 = inlined_call_operand.hbm [shape: f32[32,128], index: 2, kind: output, shape index: {}]  }
   0x1   :  { %8 = vsyncpa [#allocation6], 0 }
   0x2   :  { %9 = vsyncpa [#allocation4], 0  ;;  %s328_s9 = smov [#allocation2]  }
   0x3   :  { %s15_s10 = sshll.u32 %s328_s9, 4  ;;  %s16_s10 = int_to_ptr.vmem [resolvable:$true] %s15_s10 }
   0x4   :  { %s270_s11 = scalar_lea.vmem %s16_s10, 512  ;;  %p275_p1 = scmp.lt.s32.totalorder %s16_s10, %s16_s10 }
   0x5   :  { %p271_p0 = scmp.ne.s32.totalorder %s16_s10, %s270_s11  ;;  %p276_p2 = scmp.lt.s32.totalorder %s270_s11, %s270_s11 }
   0x7   :  { %p277_p3 = por %p276_p2, %p275_p1 }
   0x9   :  { %p278_p4 = pnand %p277_p3, %p271_p0 }
   0xb   :  { %281 = shalt.err (!%p278_p4)
}
   0xc   :  { %s329_s12 = smov 128   ;;  %s330_s13 = smov 8  }
   0xd   :  { %21 = dma.hbm_to_vmem [thread:$0]  %s366_s0, 512, %s16_s10, [#allocation3], %s329_s12, %s329_s12, %s330_s13  }
   0xe   :  { %s331_s16 = smov [#allocation5]  }
   0xf   :  { %s27_s17 = sshll.u32 %s331_s16, 4  ;;  %s28_s17 = int_to_ptr.vmem [resolvable:$true] %s27_s17 }
  0x10   :  { %s290_s18 = scalar_lea.vmem %s28_s17, 2048  ;;  %p295_p6 = scmp.lt.s32.totalorder %s28_s17, %s28_s17 }
  0x11   :  { %p291_p5 = scmp.ne.s32.totalorder %s28_s17, %s290_s18  ;;  %p296_p7 = scmp.lt.s32.totalorder %s290_s18, %s290_s18 }
  0x13   :  { %p297_p8 = por %p296_p7, %p295_p6 }
  0x15   :  { %p298_p9 = pnand %p297_p8, %p291_p5 }
  0x17   :  { %301 = shalt.err (!%p298_p9)
}
  0x18   :  { %33 = dma.hbm_to_vmem [thread:$0]  %s367_s1, 2048, %s28_s17, [#allocation6], %s329_s12, %s329_s12, %s330_s13  }
  0x19   :  { %322 = dma.done.wait [#allocation3], 512  }
  0x1a   :  { %323 = vsyncadd [#allocation3], 4294966784 }
  0x1b   :  { %324 = dma.done.wait [#allocation6], 2048  }
  0x1c   :  { %325 = vsyncadd [#allocation6], 4294965248  ;;  %v59_v0 = vld [vmem:[#allocation5 + $0x78] sm:$0xff]  ;;  %v58_v1 = vld [vmem:[#allocation5 + $0x70] sm:$0xff]  ;;  %s332_s0 = smov [#allocation7]  }
  0x1d   :  { %187 = vmatprep.subr.mxu0 %v59_v0  ;;  %225 = vmatprep.subr.mxu1 %v59_v0  ;;  %v57_v2 = vld [vmem:[#allocation5 + $0x68] sm:$0xff]  ;;  %v56_v3 = vld [vmem:[#allocation5 + $0x60] sm:$0xff]  ;;  %v55_v4 = vld [vmem:[#allocation5 + $0x58] sm:$0xff]  ;;  %s154_s1 = sshll.u32 %s332_s0, 4  ;;  %s155_s1 = int_to_ptr.vmem [resolvable:$true] %s154_s1 }
  0x1e   :  { %188 = vmatpush3.msra.mxu0 %v59_v0  ;;  %241 = vmatpush3.msra.mxu1 %v59_v0  ;;  %v54_v5 = vld [vmem:[#allocation5 + $0x50] sm:$0xff]  ;;  %v53_v6 = vld [vmem:[#allocation5 + $0x48] sm:$0xff]  ;;  %v52_v7 = vld [vmem:[#allocation5 + $0x40] sm:$0xff]  ;;  %s302_s21 = scalar_lea.vmem %s155_s1, 512  ;;  %p307_p11 = scmp.lt.s32.totalorder %s155_s1, %s155_s1 }
  0x1f   :  { %189 = vmatprep.subr.mxu0 %v58_v1  ;;  %226 = vmatprep.subr.mxu1 %v58_v1  ;;  %v51_v8 = vld [vmem:[#allocation5 + $0x38] sm:$0xff]  ;;  %v50_v9 = vld [vmem:[#allocation5 + $0x30] sm:$0xff]  ;;  %v49_v10 = vld [vmem:[#allocation5 + $0x28] sm:$0xff]  ;;  %p303_p10 = scmp.ne.s32.totalorder %s155_s1, %s302_s21  ;;  %p308_p12 = scmp.lt.s32.totalorder %s302_s21, %s302_s21 }
  0x20   :  { %190 = vmatpush3.msra.mxu0 %v58_v1  ;;  %242 = vmatpush3.msra.mxu1 %v58_v1  ;;  %v48_v11 = vld [vmem:[#allocation5 + $0x20] sm:$0xff]  ;;  %v47_v12 = vld [vmem:[#allocation5 + $0x18] sm:$0xff]  ;;  %v46_v13 = vld [vmem:[#allocation5 + $0x10] sm:$0xff] }
  0x21   :  { %191 = vmatprep.subr.mxu0 %v57_v2  ;;  %227 = vmatprep.subr.mxu1 %v57_v2  ;;  %v45_v14 = vld [vmem:[#allocation5 + $0x8] sm:$0xff]  ;;  %v44_v15 = vld [vmem:[#allocation5] sm:$0xff]  ;;  %v42_v17 = vld [vmem:[#allocation2 + $0x10] sm:$0xff]  ;;  %p309_p13 = por %p308_p12, %p307_p11 }
  0x22   :  { %192 = vmatpush3.msra.mxu0 %v57_v2  ;;  %243 = vmatpush3.msra.mxu1 %v57_v2  ;;  %v40_v16 = vld [vmem:[#allocation2] sm:$0xff]  ;;  %v41_v18 = vld [vmem:[#allocation2 + $0x8] sm:$0xff]  ;;  %v43_v19 = vld [vmem:[#allocation2 + $0x18] sm:$0xff] }
  0x23   :  { %193 = vmatprep.subr.mxu0 %v56_v3  ;;  %228 = vmatprep.subr.mxu1 %v56_v3  ;;  %p310_p0 = pnand %p309_p13, %p303_p10 }
  0x24   :  { %194 = vmatpush3.msra.mxu0 %v56_v3  ;;  %244 = vmatpush3.msra.mxu1 %v56_v3 }
  0x25   :  { %195 = vmatprep.subr.mxu0 %v55_v4  ;;  %229 = vmatprep.subr.mxu1 %v55_v4 }
  0x26   :  { %196 = vmatpush3.msra.mxu0 %v55_v4  ;;  %245 = vmatpush3.msra.mxu1 %v55_v4 }
  0x27   :  { %197 = vmatprep.subr.mxu0 %v54_v5  ;;  %230 = vmatprep.subr.mxu1 %v54_v5 }
  0x28   :  { %198 = vmatpush3.msra.mxu0 %v54_v5  ;;  %246 = vmatpush3.msra.mxu1 %v54_v5 }
  0x29   :  { %199 = vmatprep.subr.mxu0 %v53_v6  ;;  %231 = vmatprep.subr.mxu1 %v53_v6 }
  0x2a   :  { %200 = vmatpush3.msra.mxu0 %v53_v6  ;;  %247 = vmatpush3.msra.mxu1 %v53_v6 }
  0x2b   :  { %201 = vmatprep.subr.mxu0 %v52_v7  ;;  %232 = vmatprep.subr.mxu1 %v52_v7 }
  0x2c   :  { %202 = vmatpush3.msra.mxu0 %v52_v7  ;;  %248 = vmatpush3.msra.mxu1 %v52_v7 }
  0x2d   :  { %203 = vmatprep.subr.mxu0 %v51_v8  ;;  %233 = vmatprep.subr.mxu1 %v51_v8 }
  0x2e   :  { %204 = vmatpush3.msra.mxu0 %v51_v8  ;;  %249 = vmatpush3.msra.mxu1 %v51_v8 }
  0x2f   :  { %205 = vmatprep.subr.mxu0 %v50_v9  ;;  %234 = vmatprep.subr.mxu1 %v50_v9 }
  0x30   :  { %206 = vmatpush3.msra.mxu0 %v50_v9  ;;  %250 = vmatpush3.msra.mxu1 %v50_v9 }
  0x31   :  { %207 = vmatprep.subr.mxu0 %v49_v10  ;;  %235 = vmatprep.subr.mxu1 %v49_v10 }
  0x32   :  { %208 = vmatpush3.msra.mxu0 %v49_v10  ;;  %251 = vmatpush3.msra.mxu1 %v49_v10 }
  0x33   :  { %209 = vmatprep.subr.mxu0 %v48_v11  ;;  %236 = vmatprep.subr.mxu1 %v48_v11 }
  0x34   :  { %210 = vmatpush3.msra.mxu0 %v48_v11  ;;  %252 = vmatpush3.msra.mxu1 %v48_v11 }
  0x35   :  { %211 = vmatprep.subr.mxu0 %v47_v12  ;;  %237 = vmatprep.subr.mxu1 %v47_v12 }
  0x36   :  { %212 = vmatpush3.msra.mxu0 %v47_v12  ;;  %253 = vmatpush3.msra.mxu1 %v47_v12 }
  0x37   :  { %213 = vmatprep.subr.mxu0 %v46_v13  ;;  %238 = vmatprep.subr.mxu1 %v46_v13 }
  0x38   :  { %214 = vmatpush3.msra.mxu0 %v46_v13  ;;  %254 = vmatpush3.msra.mxu1 %v46_v13 }
  0x39   :  { %215 = vmatprep.subr.mxu0 %v45_v14  ;;  %239 = vmatprep.subr.mxu1 %v45_v14 }
  0x3a   :  { %216 = vmatpush3.msra.mxu0 %v45_v14  ;;  %255 = vmatpush3.msra.mxu1 %v45_v14 }
  0x3b   :  { %217 = vmatprep.subr.mxu0 %v44_v15  ;;  %240 = vmatprep.subr.mxu1 %v44_v15 }
  0x3c   :  { %218 = vmatpush3.msra.mxu0 %v44_v15  ;;  %256 = vmatpush3.msra.mxu1 %v44_v15 }
  0x3d   :  { %219 = vmatprep.mubr.f32.mxu0 %v40_v16  ;;  %222 = vmatprep.mubr.f32.mxu1 %v42_v17 }
  0x3e   :  { %220 = vmatmul.mubr.f32.vlgmr.msra.gmra.mxu0 %v41_v18  ;;  %223 = vmatmul.mubr.f32.vlgmr.msra.gmra.mxu1 %v43_v19 }
  0xfe   :  { %v221_v20 = vpop.f32.mrf.mxu0  ;;  %v224_v21 = vpop.f32.mrf.mxu1 }
  0xff   :  { %146 = vst [vmem:[#allocation7 + $0x8] sm:$0xff] %v221_v20  ;;  %148 = vst [vmem:[#allocation7 + $0x18] sm:$0xff] %v224_v21 }
 0x100   :  { %v126_v22 = vpop.f32.mrf.mxu0  ;;  %v136_v23 = vpop.f32.mrf.mxu1 }
 0x101   :  { %145 = vst [vmem:[#allocation7] sm:$0xff] %v126_v22  ;;  %147 = vst [vmem:[#allocation7 + $0x10] sm:$0xff] %v136_v23 }
 0x102   :  { %313 = shalt.err (!%p310_p0)
}
 0x103   :  { %160 = dma.vmem_to_hbm [thread:$0]  %s155_s1, 512, %s368_s2, [#allocation4], %s329_s12, %s329_s12, %s330_s13  }
 0x104   :  { %326 = dma.done.wait [#allocation4], 512  }
 0x105   :  { %327 = vsyncadd [#allocation4], 4294966784 }
 0x106   :  { %164 = vsyncpa [#allocation3], 1 }
 0x107   :  { %165 = vsyncpa [#allocation6], 1 }
 0x108   :  { %166 = vsyncpa [#allocation4], 1 }

</bundles_post_ra>
